<compile_context>
chip_gen: v6e
topology: v6e:2x2x1
jax: 0.10.0
libtpu: 0.0.40
codegen_flags: <defaults>
</compile_context>

<pallas_src>
import jax
import jax.numpy as jnp
from jax.experimental import pallas as pl
from jax.experimental.pallas import tpu as pltpu


def _scale_kernel(x_ref, s_ref, o_ref):
    # x_ref: (tr, cols) tile of the folded input
    # s_ref: (1, cols)  lane-aligned, pre-tiled scale vector (resident across the grid)
    # o_ref: (tr, cols) output tile
    o_ref[...] = (x_ref[...] * s_ref[...]).astype(o_ref.dtype)


def _fold_cols(shape, min_cols=512, max_cols=16384):
    """Fold trailing dims into a lane-dense column count.

    Each folded row starts at a multiple of C in the flat channels-last layout, so the
    per-channel scale pattern repeats cleanly along the folded column axis.
    Returns (rows, cols) with cols a multiple of shape[-1].
    """
    *lead, cols = shape
    lead = list(lead)
    while lead and cols < min_cols and cols * lead[-1] <= max_cols:
        cols *= lead.pop()
    rows = 1
    for d in lead:
        rows *= d
    return rows, cols


def _pick_row_tile(rows, cols, itemsize, target_bytes=1 << 20):
    """Largest multiple-of-8 row tile giving ~target_bytes per block (or full rows)."""
    if rows <= 8:
        return rows
    max_rows = max(8, target_bytes // max(1, cols * itemsize))
    tr = min(rows, max_rows)
    tr = max(8, (tr // 8) * 8)
    return rows if tr >= rows else tr


def scale_forward(x, scale):
    """out = x * scale, with x: (..., C) channels-last and scale: (C,)."""
    orig_shape = x.shape
    C = orig_shape[-1]
    assert scale.shape == (C,)

    rows, cols = _fold_cols(orig_shape)
    reps = cols // C

    x2d = x.reshape(rows, cols)                               # contiguous view, no copy
    s_row = jnp.tile(scale.astype(x.dtype), reps).reshape(1, cols)

    tr = _pick_row_tile(rows, cols, x.dtype.itemsize)
    grid = (pl.cdiv(rows, tr),)

    out2d = pl.pallas_call(
        _scale_kernel,
        out_shape=jax.ShapeDtypeStruct((rows, cols), x.dtype),
        grid_spec=pltpu.PrefetchScalarGridSpec(
            num_scalar_prefetch=0,
            grid=grid,
            in_specs=[
                pl.BlockSpec((tr, cols), lambda i: (i, 0)),   # row-tiled input slab
                pl.BlockSpec((1, cols), lambda i: (0, 0)),    # resident scale row
            ],
            out_specs=pl.BlockSpec((tr, cols), lambda i: (i, 0)),
        ),
        compiler_params=pltpu.CompilerParams(
            dimension_semantics=("parallel",),
        ),
    )(x2d, s_row)

    return out2d.reshape(orig_shape)


if __name__ == "__main__":
    key = jax.random.PRNGKey(0)
    k_scale, k_x = jax.random.split(key)

    # Channels-last, as MetaFormer applies Scale (layer-scale on token/MLP branches).
    B, H, W, C = 2, 8, 8, 32
    init_value = 1.0

    # The module initializes scale to init_value * ones, but it is a trainable
    # parameter; use a non-trivial deterministic vector so the broadcast is exercised.
    scale = init_value * (
        1.0 + 0.1 * jax.random.normal(k_scale, (C,), dtype=jnp.float32)
    )
    x = jax.random.normal(k_x, (B, H, W, C), dtype=jnp.float32)

    out = scale_forward(x, scale)
    out = jax.block_until_ready(out)

    # Reference: same semantics as torch's `x * self.scale` (broadcast over last dim).
    ref = x * scale
    assert jnp.allclose(out, ref, atol=1e-6, rtol=1e-6), "mismatch vs reference"

    print("KERNEL_OK")
</pallas_src>

<mosaic_0001>
module attributes {stable_mosaic.version = 11 : i64} {
  func.func @_scale_kernel(%arg0: i32, %arg1: memref<2x2048xf32, #tpu.memory_space<vmem>>, %arg2: memref<1x2048xf32, #tpu.memory_space<vmem>>, %arg3: memref<2x2048xf32, #tpu.memory_space<vmem>>) attributes {dimension_semantics = [#tpu.dimension_semantics<parallel>], iteration_bounds = array<i64: 1>, scalar_prefetch = 0 : i64, scratch_operands = 0 : i64, tpu.core_type = #tpu.core_type<tc>, window_params = [{transform_indices = @transform_0, window_bounds = array<i64: 2, 2048>}, {pipeline_mode = #tpu.pipeline_mode<synchronous>, transform_indices = @transform_1, window_bounds = array<i64: 1, 2048>}, {transform_indices = @transform_2, window_bounds = array<i64: 2, 2048>}]} {
    %c0 = arith.constant 0 : index
    %c0_0 = arith.constant 0 : index
    %0 = vector.load %arg1[%c0, %c0_0] : memref<2x2048xf32, #tpu.memory_space<vmem>>, vector<2x2048xf32>
    %c0_1 = arith.constant 0 : index
    %c0_2 = arith.constant 0 : index
    %1 = vector.load %arg2[%c0_1, %c0_2] : memref<1x2048xf32, #tpu.memory_space<vmem>>, vector<1x2048xf32>
    %2 = vector.broadcast %1 : vector<1x2048xf32> to vector<2x2048xf32>
    %3 = arith.mulf %0, %2 : vector<2x2048xf32>
    %c0_3 = arith.constant 0 : index
    %c0_4 = arith.constant 0 : index
    %4 = vector.load %arg3[%c0_3, %c0_4] : memref<2x2048xf32, #tpu.memory_space<vmem>>, vector<2x2048xf32>
    tpu.vector_store %arg3[%c0_3, %c0_4], %3 {strides = array<i32>} : memref<2x2048xf32, #tpu.memory_space<vmem>>, vector<2x2048xf32>,
    return
  }
  func.func @transform_0(%arg0: i32) -> (i32, i32) {
    %c0_i32 = arith.constant 0 : i32
    %c0_i32_0 = arith.constant 0 : i32
    return %arg0, %c0_i32 : i32, i32
  }
  func.func @transform_1(%arg0: i32) -> (i32, i32) {
    %c0_i32 = arith.constant 0 : i32
    %c0_i32_0 = arith.constant 0 : i32
    %c0_i32_1 = arith.constant 0 : i32
    return %c0_i32, %c0_i32_0 : i32, i32
  }
  func.func @transform_2(%arg0: i32) -> (i32, i32) {
    %c0_i32 = arith.constant 0 : i32
    %c0_i32_0 = arith.constant 0 : i32
    return %arg0, %c0_i32 : i32, i32
  }
}

</mosaic_0001>

<bundles_post_ra>
// kernel: tpu_custom_call.1
= control target key start
LH: loop header
LB: loop body
LE: loop exit
PB: predicated region body
PF: predicated region fallthrough
CT: control target
= control target key end

     0   :  { %7 = vsyncpa [#allocation3], 0  ;;  %s302_s0 = inlined_call_operand.hbm [shape: f32[2,2048], index: 0, kind: input, shape index: {}]   ;;  %s303_s1 = inlined_call_operand.hbm [shape: f32[1,2048], index: 1, kind: input, shape index: {}]   ;;  %s304_s2 = inlined_call_operand.hbm [shape: f32[2,2048], index: 2, kind: output, shape index: {}]  }
   0x1   :  { %8 = vsyncpa [#allocation6], 0 }
   0x2   :  { %9 = vsyncpa [#allocation4], 0  ;;  %s274_s9 = smov [#allocation2]   ;;  %s275_s11 = smov [#allocation5]  }
   0x3   :  { %s16_s10 = sshll.u32 %s274_s9, 4  ;;  %s26_s12 = sshll.u32 %s275_s11, 4  ;;  %s17_s10 = int_to_ptr.vmem [resolvable:$true] %s16_s10  ;;  %s27_s12 = int_to_ptr.vmem [resolvable:$true] %s26_s12 }
   0x4   :  { %s216_s13 = scalar_lea.vmem %s17_s10, 512  ;;  %p221_p1 = scmp.lt.s32.totalorder %s17_s10, %s17_s10 }
   0x5   :  { %p217_p0 = scmp.ne.s32.totalorder %s17_s10, %s216_s13  ;;  %p222_p2 = scmp.lt.s32.totalorder %s216_s13, %s216_s13 }
   0x7   :  { %p223_p3 = por %p222_p2, %p221_p1 }
   0x9   :  { %p224_p4 = pnand %p223_p3, %p217_p0 }
   0xb   :  { %227 = shalt.err (!%p224_p4)
}
   0xc   :  { %19 = dma.hbm_to_vmem [thread:$0]  %s302_s0, 512, %s17_s10, [#allocation3]  }
   0xd   :  { %s236_s16 = scalar_lea.vmem %s27_s12, 256  ;;  %p241_p6 = scmp.lt.s32.totalorder %s27_s12, %s27_s12 }
   0xe   :  { %p237_p5 = scmp.ne.s32.totalorder %s27_s12, %s236_s16  ;;  %p242_p7 = scmp.lt.s32.totalorder %s236_s16, %s236_s16 }
  0x10   :  { %p243_p8 = por %p242_p7, %p241_p6 }
  0x12   :  { %p244_p9 = pnand %p243_p8, %p237_p5 }
  0x14   :  { %247 = shalt.err (!%p244_p9)
}
  0x15   :  { %29 = dma.hbm_to_vmem [thread:$0]  %s303_s1, 256, %s27_s12, [#allocation6]  }
  0x16   :  { %268 = dma.done.wait [#allocation3], 512  }
  0x17   :  { %269 = vsyncadd [#allocation3], 4294966784 }
  0x18   :  { %270 = dma.done.wait [#allocation6], 256  }
  0x19   :  { %271 = vsyncadd [#allocation6], 4294967040  ;;  %v44_v0 = vlaneseq  ;;  %v276_v1 = vmov 1983009808   ;;  %v40_v13 = vld [vmem:[#allocation5] sm:$0xff]  ;;  %v41_v19 = vld [vmem:[#allocation5 + $0x8] sm:$0xff] }
  0x1a   :  { %v111_v2 = vunpack.c.l.s4 %v276_v1  ;;  %v36_v36 = vld [vmem:[#allocation2] sm:$0xff]  ;;  %v37_v42 = vld [vmem:[#allocation2 + $0x8] sm:$0xff]  ;;  %v38_v50 = vld [vmem:[#allocation2 + $0x10] sm:$0xff]  ;;  %s277_s0 = smov [#allocation7]  }
  0x1b   :  { %v45_v3 = vshrl.u32 %v44_v0, 7  ;;  %v39_v57 = vld [vmem:[#allocation2 + $0x18] sm:$0xff]  ;;  %s194_s1 = sshll.u32 %s277_s0, 4  ;;  %s195_s1 = int_to_ptr.vmem [resolvable:$true] %s194_s1 }
  0x1c   :  { %v112_v4 = vunpack.c.0.s8 %v111_v2  ;;  %s248_s19 = scalar_lea.vmem %s195_s1, 512  ;;  %p253_p11 = scmp.lt.s32.totalorder %s195_s1, %s195_s1 }
  0x1d   :  { %v46_v5 = vsub.s32 0, %v45_v3  ;;  %v50_v6 = vsub.s32 1, %v45_v3  ;;  %v54_v7 = vsub.s32 2, %v45_v3  ;;  %v58_v8 = vsub.s32 3, %v45_v3  ;;  %p249_p10 = scmp.ne.s32.totalorder %s195_s1, %s248_s19  ;;  %p254_p12 = scmp.lt.s32.totalorder %s248_s19, %s248_s19 }
  0x1e   :  { %v62_v9 = vsub.s32 4, %v45_v3  ;;  %v66_v10 = vsub.s32 5, %v45_v3  ;;  %v70_v11 = vsub.s32 6, %v45_v3  ;;  %v74_v12 = vsub.s32 7, %v45_v3 }
  0x1f   :  { %v115_v14 = vsub.s32 %v112_v4, %v45_v3  ;;  %v47_v15 = vrot.slane %v40_v13, %v46_v5  ;;  %v51_v16 = vrot.slane %v40_v13, %v50_v6  ;;  %v55_v17 = vrot.slane %v40_v13, %v54_v7  ;;  %p255_p13 = por %p254_p12, %p253_p11 }
  0x20   :  { %v59_v18 = vrot.slane %v40_v13, %v58_v8  ;;  %v63_v20 = vrot.slane %v40_v13, %v62_v9  ;;  %v67_v21 = vrot.slane %v40_v13, %v66_v10  ;;  %v71_v22 = vrot.slane %v40_v13, %v70_v11 }
  0x21   :  { %v75_v23 = vrot.slane %v40_v13, %v74_v12  ;;  %v108_v24 = vcombine.low %v47_v15, %v51_v16  ;;  %v79_v26 = vrot.slane %v41_v19, %v46_v5  ;;  %v83_v27 = vrot.slane %v41_v19, %v50_v6  ;;  %p256_p0 = pnand %p255_p13, %p249_p10 }
  0x22   :  { %v109_v25 = vcombine.low %v55_v17, %v59_v18  ;;  %v125_v28 = vcombine.low %v63_v20, %v67_v21  ;;  %v87_v30 = vrot.slane %v41_v19, %v54_v7  ;;  %v91_v31 = vrot.slane %v41_v19, %v58_v8 }
  0x23   :  { %v126_v29 = vcombine.low %v71_v22, %v75_v23  ;;  %v116_v32 = vrot.slane %v108_v24, %v115_v14  ;;  %v142_v34 = vcombine.low %v79_v26, %v83_v27  ;;  %v95_v35 = vrot.slane %v41_v19, %v62_v9 }
  0x24   :  { %v123_v33 = vrot.slane %v109_v25, %v115_v14  ;;  %v133_v37 = vrot.slane %v125_v28, %v115_v14  ;;  %v143_v39 = vcombine.low %v87_v30, %v91_v31  ;;  %v99_v40 = vrot.slane %v41_v19, %v66_v10 }
  0x25   :  { %v140_v38 = vrot.slane %v126_v29, %v115_v14  ;;  %v150_v43 = vrot.slane %v142_v34, %v115_v14  ;;  %v103_v44 = vrot.slane %v41_v19, %v70_v11  ;;  %v107_v45 = vrot.slane %v41_v19, %v74_v12 }
  0x26   :  { %v124_v41 = vcombine.low %v116_v32, %v123_v33  ;;  %v157_v47 = vrot.slane %v143_v39, %v115_v14  ;;  %v159_v48 = vcombine.low %v95_v35, %v99_v40 }
  0x27   :  { %v141_v46 = vcombine.low %v133_v37, %v140_v38  ;;  %v160_v51 = vcombine.low %v103_v44, %v107_v45 }
  0x28   :  { %v180_v49 = vmul.f32 %v124_v41, %v36_v36  ;;  %v158_v53 = vcombine.low %v150_v43, %v157_v47  ;;  %v167_v54 = vrot.slane %v159_v48, %v115_v14 }
  0x29   :  { %v181_v52 = vmul.f32 %v141_v46, %v37_v42  ;;  %v174_v55 = vrot.slane %v160_v51, %v115_v14 }
  0x2a   :  { %184 = vst [vmem:[#allocation7] sm:$0xff] %v180_v49  ;;  %v182_v56 = vmul.f32 %v158_v53, %v38_v50 }
  0x2b   :  { %185 = vst [vmem:[#allocation7 + $0x8] sm:$0xff] %v181_v52  ;;  %v175_v58 = vcombine.low %v167_v54, %v174_v55 }
  0x2c   :  { %186 = vst [vmem:[#allocation7 + $0x10] sm:$0xff] %v182_v56 }
  0x2d   :  { %v183_v59 = vmul.f32 %v175_v58, %v39_v57 }
  0x2f   :  { %187 = vst [vmem:[#allocation7 + $0x18] sm:$0xff] %v183_v59 }
  0x30   :  { %259 = shalt.err (!%p256_p0)
}
  0x31   :  { %197 = dma.vmem_to_hbm [thread:$0]  %s195_s1, 512, %s304_s2, [#allocation4]  }
  0x32   :  { %272 = dma.done.wait [#allocation4], 512  }
  0x33   :  { %273 = vsyncadd [#allocation4], 4294966784 }
  0x34   :  { %201 = vsyncpa [#allocation3], 1 }
  0x35   :  { %202 = vsyncpa [#allocation6], 1 }
  0x36   :  { %203 = vsyncpa [#allocation4], 1 }

</bundles_post_ra>
